<compile_context>
chip_gen: v7x
topology: tpu7x:2x2x1
jax: 0.10.0
libtpu: 0.0.40
codegen_flags: <defaults>
</compile_context>

<pallas_src>
import functools

import jax
import jax.numpy as jnp
from jax.experimental import pallas as pl
from jax.experimental.pallas import tpu as pltpu

_LANE = 128
_SUBLANE = 8
_MAX_BLOCK_BYTES = 4 * 1024 * 1024   # ~4 MiB per input block target


def _round_up(n, m):
    return ((n + m - 1) // m) * m


def _num_tensorcores():
    """Best-effort TensorCore-per-device count (2 on v7x, 1 on v5e/v6e)."""
    try:
        info = pltpu.get_tpu_info()
        for name in ("num_cores", "core_count", "num_tensorcores",
                     "tensorcore_count", "cores_per_chip"):
            n = getattr(info, name, None)
            if isinstance(n, int) and n >= 1:
                return n
    except Exception:
        pass
    try:
        kind = jax.devices()[0].device_kind.lower()
        if "v7" in kind:
            return 2
    except Exception:
        pass
    return 1


def _temporal_loss2_kernel(x_ref, x1_ref, o_ref, *, rows, block_rows,
                           last_block, ragged_last, clamped):
    p = pl.program_id(0)          # TensorCore shard
    i = pl.program_id(1)          # sequential reduction step within the shard

    @pl.when(i == 0)
    def _init():
        o_ref[...] = jnp.zeros_like(o_ref)

    def _accumulate(mask_tail):
        # Upcast in-kernel so bf16 frames stream at half the HBM bytes while the
        # accumulation stays f32.
        d = x_ref[...].astype(jnp.float32) - x1_ref[...].astype(jnp.float32)
        sq = d * d
        if mask_tail:
            # Last logical block may be partial: rows at/after `rows` hold
            # undefined data from the partial DMA -> zero them (after the
            # square; jnp.where discards any NaN/Inf from garbage).
            row0 = last_block * block_rows
            local_row = jax.lax.broadcasted_iota(jnp.int32, sq.shape, 0)
            sq = jnp.where(row0 + local_row < rows, sq, 0.0)
        # (block_rows, 128) -> (8, 128): groups of 8 rows collapse with pure
        # vreg adds (VPU only), accumulated into the revisited output block.
        o_ref[...] += jnp.sum(
            sq.reshape(block_rows // _SUBLANE, _SUBLANE, _LANE), axis=0)

    if not ragged_last and not clamped:
        # Fast path: every block is full and real -> no mask, no pl.when.
        _accumulate(False)
    else:
        blk = p * pl.num_programs(1) + i   # logical block id (pre-clamp)

        @pl.when(blk < last_block)
        def _interior():                    # full interior block, unmasked
            _accumulate(False)

        @pl.when(blk == last_block)
        def _last():                        # last real block, masked iff ragged
            _accumulate(ragged_last)
        # blk > last_block: clamped duplicate from the core split -> skip.


def temporal_loss2(x, x1):
    """Pallas equivalent of TemporalLoss2.forward(x, x1): sum((x-x1)^2)/numel."""
    assert x.shape == x1.shape, "frames must have identical shapes"
    d_elems = x.size  # D in the PyTorch module

    xf = jnp.reshape(x, (-1,))
    x1f = jnp.reshape(x1, (-1,))

    # Only the (rare) numel % 128 != 0 case still pads; padded zeros contribute
    # nothing to the sum. Block-level raggedness is handled in-kernel.
    # TODO(synk): fold the <128-element lane remainder into the kernel to avoid
    # this full-copy pad for lane-unaligned sizes.
    rem = d_elems % _LANE
    if rem:
        pad = _LANE - rem
        xf = jnp.pad(xf, (0, pad))
        x1f = jnp.pad(x1f, (0, pad))

    rows = xf.shape[0] // _LANE
    x2d = jnp.reshape(xf, (rows, _LANE))      # free metadata reshape
    x12d = jnp.reshape(x1f, (rows, _LANE))

    itemsize = jnp.dtype(x2d.dtype).itemsize
    # Sublane packing granule: 8 rows for 32-bit, 16 for bf16, 32 for 8-bit.
    sub = _SUBLANE * max(1, 4 // max(1, itemsize))
    max_rows = max(sub, (_MAX_BLOCK_BYTES // (_LANE * itemsize)) // sub * sub)
    block_rows = min(max_rows, _round_up(rows, sub))
    num_blocks = pl.cdiv(rows, block_rows)

    # Shard the streaming reduction across TensorCores only when there is more
    # than one core (v7x); on single-TC v5e/v6e this stays 1 and avoids both the
    # duplicated edge DMA and any extra masking.
    split = 2 if (_num_tensorcores() >= 2 and num_blocks >= 2) else 1
    inner = pl.cdiv(num_blocks, split)
    clamped = split * inner != num_blocks          # duplicate trailing block(s)
    ragged_last = num_blocks * block_rows != rows  # partial last block
    last_block = num_blocks - 1

    def in_index_map(p, i):
        blk = p * inner + i
        if clamped:
            blk = jnp.minimum(blk, last_block)   # keep DMA in-bounds; skipped in-kernel
        return (blk, 0)

    kernel = functools.partial(
        _temporal_loss2_kernel,
        rows=rows, block_rows=block_rows, last_block=last_block,
        ragged_last=ragged_last, clamped=clamped)

    # Right-size VMEM: 2 inputs x 2 pipeline buffers x block + output + slack.
    block_bytes = block_rows * _LANE * itemsize
    vmem_limit = max(16 * 1024 * 1024, 4 * block_bytes + 4 * 1024 * 1024)

    partials = pl.pallas_call(
        kernel,
        out_shape=jax.ShapeDtypeStruct((split * _SUBLANE, _LANE), jnp.float32),
        grid_spec=pltpu.PrefetchScalarGridSpec(
            num_scalar_prefetch=0,
            grid=(split, inner),
            in_specs=[
                pl.BlockSpec((block_rows, _LANE), in_index_map),
                pl.BlockSpec((block_rows, _LANE), in_index_map),
            ],
            out_specs=pl.BlockSpec((_SUBLANE, _LANE), lambda p, i: (p, 0)),
        ),
        # NOTE: on v7x, verify via xprof that the leading "parallel" axis really
        # shards across the 2 TensorCores; if not, switch it to CORE_PARALLEL.
        compiler_params=pltpu.CompilerParams(
            dimension_semantics=("parallel", "arbitrary"),
            vmem_limit_bytes=int(vmem_limit),
        ),
    )(x2d, x12d)

    # Tiny final reduce (at most 16x128 f32 = 8 KiB) + 1/D scaling.
    return jnp.sum(partials) / jnp.float32(d_elems)


if __name__ == "__main__":
    key = jax.random.PRNGKey(0)
    k = jax.random.split(key, 8)

    def ref_loss(a, b):
        af = a.astype(jnp.float32).reshape(1, -1)
        bf = b.astype(jnp.float32).reshape(1, -1)
        return jnp.sum((af - bf) ** 2) / a.size

    # Frame t and frame t-1, NCHW (batch=2, channels=4, spatial=16x16).
    x = jax.random.normal(k[0], (2, 4, 16, 16), dtype=jnp.float32)
    x1 = jax.random.normal(k[1], (2, 4, 16, 16), dtype=jnp.float32)
    loss = temporal_loss2(x, x1)
    jax.block_until_ready(loss)
    assert jnp.allclose(loss, ref_loss(x, x1), rtol=1e-5, atol=1e-5), (loss, ref_loss(x, x1))

    # Larger frame: multi-block grid, gated ragged-last-block mask, core split
    # when >1 TensorCore is present.
    y = jax.random.normal(k[2], (2, 4, 512, 300), dtype=jnp.float32)
    y1 = jax.random.normal(k[3], (2, 4, 512, 300), dtype=jnp.float32)
    loss2 = temporal_loss2(y, y1)
    jax.block_until_ready(loss2)
    assert jnp.allclose(loss2, ref_loss(y, y1), rtol=1e-4, atol=1e-4), (loss2, ref_loss(y, y1))

    # rows not a multiple of 8: single partial block larger than the array.
    z = jax.random.normal(k[4], (3, 5, 7, 128), dtype=jnp.float32)
    z1 = jax.random.normal(k[5], (3, 5, 7, 128), dtype=jnp.float32)
    loss3 = temporal_loss2(z, z1)
    jax.block_until_ready(loss3)
    assert jnp.allclose(loss3, ref_loss(z, z1), rtol=1e-5, atol=1e-5), (loss3, ref_loss(z, z1))

    # bf16 frames stream at half the HBM bytes; accumulation is still f32.
    w = jax.random.normal(k[6], (2, 4, 16, 16), dtype=jnp.bfloat16)
    w1 = jax.random.normal(k[7], (2, 4, 16, 16), dtype=jnp.bfloat16)
    loss4 = temporal_loss2(w, w1)
    jax.block_until_ready(loss4)
    assert jnp.allclose(loss4, ref_loss(w, w1), rtol=1e-3, atol=1e-3), (loss4, ref_loss(w, w1))

    print("KERNEL_OK")
</pallas_src>

<mosaic_0001>
module attributes {stable_mosaic.version = 11 : i64} {
  func.func @_temporal_loss2_kernel(%arg0: i32, %arg1: i32, %arg2: memref<16x128xf32, #tpu.memory_space<vmem>>, %arg3: memref<16x128xf32, #tpu.memory_space<vmem>>, %arg4: memref<8x128xf32, #tpu.memory_space<vmem>>) attributes {dimension_semantics = [#tpu.dimension_semantics<parallel>, #tpu.dimension_semantics<arbitrary>], iteration_bounds = array<i64: 1, 1>, scalar_prefetch = 0 : i64, scratch_operands = 0 : i64, tpu.core_type = #tpu.core_type<tc>, window_params = [{transform_indices = @transform_0, window_bounds = array<i64: 16, 128>}, {transform_indices = @transform_1, window_bounds = array<i64: 16, 128>}, {transform_indices = @transform_2, window_bounds = array<i64: 8, 128>}]} {
    %c0_i32 = arith.constant 0 : i32
    %0 = arith.cmpi eq, %arg1, %c0_i32 : i32
    %1 = arith.extui %0 : i1 to i32
    %c0_i32_0 = arith.constant 0 : i32
    %2 = arith.cmpi ne, %1, %c0_i32_0 : i32
    scf.if %2 {
      %cst_8 = arith.constant 0.000000e+00 : f32
      %12 = vector.broadcast %cst_8 : f32 to vector<8x128xf32>
      %c0_9 = arith.constant 0 : index
      %c0_10 = arith.constant 0 : index
      %13 = vector.load %arg4[%c0_9, %c0_10] : memref<8x128xf32, #tpu.memory_space<vmem>>, vector<8x128xf32>
      tpu.vector_store %arg4[%c0_9, %c0_10], %12 {strides = array<i32>} : memref<8x128xf32, #tpu.memory_space<vmem>>, vector<8x128xf32>,
    } else {
    }
    %c0 = arith.constant 0 : index
    %c0_1 = arith.constant 0 : index
    %3 = vector.load %arg2[%c0, %c0_1] : memref<16x128xf32, #tpu.memory_space<vmem>>, vector<16x128xf32>
    %c0_2 = arith.constant 0 : index
    %c0_3 = arith.constant 0 : index
    %4 = vector.load %arg3[%c0_2, %c0_3] : memref<16x128xf32, #tpu.memory_space<vmem>>, vector<16x128xf32>
    %5 = arith.subf %3, %4 : vector<16x128xf32>
    %6 = arith.mulf %5, %5 : vector<16x128xf32>
    %c0_4 = arith.constant 0 : index
    %c0_5 = arith.constant 0 : index
    %7 = vector.load %arg4[%c0_4, %c0_5] : memref<8x128xf32, #tpu.memory_space<vmem>>, vector<8x128xf32>
    %8 = vector.shape_cast %6 : vector<16x128xf32> to vector<2x8x128xf32>
    %cst = arith.constant dense<0.000000e+00> : vector<8x128xf32>
    %9 = vector.multi_reduction <add>, %8, %cst [0] : vector<2x8x128xf32> to vector<8x128xf32>
    %10 = arith.addf %7, %9 : vector<8x128xf32>
    %c0_6 = arith.constant 0 : index
    %c0_7 = arith.constant 0 : index
    %11 = vector.load %arg4[%c0_6, %c0_7] : memref<8x128xf32, #tpu.memory_space<vmem>>, vector<8x128xf32>
    tpu.vector_store %arg4[%c0_6, %c0_7], %10 {strides = array<i32>} : memref<8x128xf32, #tpu.memory_space<vmem>>, vector<8x128xf32>,
    return
  }
  func.func @transform_0(%arg0: i32, %arg1: i32) -> (i32, i32) {
    %c1_i32 = arith.constant 1 : i32
    %0 = arith.muli %arg0, %c1_i32 : i32
    %1 = arith.addi %0, %arg1 : i32
    %c0_i32 = arith.constant 0 : i32
    %c0_i32_0 = arith.constant 0 : i32
    return %1, %c0_i32 : i32, i32
  }
  func.func @transform_1(%arg0: i32, %arg1: i32) -> (i32, i32) {
    %c1_i32 = arith.constant 1 : i32
    %0 = arith.muli %arg0, %c1_i32 : i32
    %1 = arith.addi %0, %arg1 : i32
    %c0_i32 = arith.constant 0 : i32
    %c0_i32_0 = arith.constant 0 : i32
    return %1, %c0_i32 : i32, i32
  }
  func.func @transform_2(%arg0: i32, %arg1: i32) -> (i32, i32) {
    %c0_i32 = arith.constant 0 : i32
    %c0_i32_0 = arith.constant 0 : i32
    return %arg0, %c0_i32 : i32, i32
  }
}

</mosaic_0001>

<bundles_post_ra>
// kernel: tpu_custom_call.1
= control target key start
LH: loop header
LB: loop body
LE: loop exit
PB: predicated region body
PF: predicated region fallthrough
CT: control target
= control target key end

     0   :  { %7 = vsyncpa [#allocation3], 0  ;;  %s219_s0 = inlined_call_operand.hbm [shape: f32[16,128], index: 0, kind: input, shape index: {}]   ;;  %s220_s1 = inlined_call_operand.hbm [shape: f32[16,128], index: 1, kind: input, shape index: {}]   ;;  %s221_s2 = inlined_call_operand.hbm [shape: f32[8,128], index: 2, kind: output, shape index: {}]  }
   0x1   :  { %8 = vsyncpa [#allocation6], 0 }
   0x2   :  { %9 = vsyncpa [#allocation4], 0  ;;  %s163_s9 = smov [#allocation2]   ;;  %s91_s13 = scalar_lea.hbm %s219_s0, 256 }
   0x3   :  { %s19_s10 = sshll.u32 %s163_s9, 4  ;;  %p92_p0 = scmp.ne.s32.totalorder %s219_s0, %s91_s13  ;;  %s20_s10 = int_to_ptr.vmem [resolvable:$true] %s19_s10 }
   0x4   :  { %p95_p1 = scmp.lt.u32.totalorder %s91_s13, %s219_s0 }
   0x6   :  { %p97_p2 = pnand %p95_p1, %p92_p0 }
   0x8   :  { %100 = shalt.err (!%p97_p2)
}
   0x9   :  { %s101_s18 = scalar_lea.vmem %s20_s10, 256  ;;  %p106_p4 = scmp.lt.s32.totalorder %s20_s10, %s20_s10 }
   0xa   :  { %p102_p3 = scmp.ne.s32.totalorder %s20_s10, %s101_s18  ;;  %p107_p5 = scmp.lt.s32.totalorder %s101_s18, %s101_s18 }
   0xc   :  { %p108_p6 = por %p107_p5, %p106_p4 }
   0xe   :  { %p109_p7 = pnand %p108_p6, %p102_p3 }
  0x10   :  { %112 = shalt.err (!%p109_p7)
}
  0x11   :  { %s164_s19 = smov 128   ;;  %s165_s20 = smov 8  }
  0x12   :  { %25 = dma.hbm_to_vmem [thread:$0]  %s219_s0, 256, %s20_s10, [#allocation3], %s164_s19, %s164_s19, %s165_s20  }
  0x13   :  { %s166_s23 = smov [#allocation5]   ;;  %s113_s27 = scalar_lea.hbm %s220_s1, 256 }
  0x14   :  { %s35_s24 = sshll.u32 %s166_s23, 4  ;;  %p114_p8 = scmp.ne.s32.totalorder %s220_s1, %s113_s27  ;;  %s36_s24 = int_to_ptr.vmem [resolvable:$true] %s35_s24 }
  0x15   :  { %p117_p9 = scmp.lt.u32.totalorder %s113_s27, %s220_s1 }
  0x17   :  { %p119_p10 = pnand %p117_p9, %p114_p8 }
  0x19   :  { %122 = shalt.err (!%p119_p10)
}
  0x1a   :  { %s123_s4 = scalar_lea.vmem %s36_s24, 256  ;;  %p128_p12 = scmp.lt.s32.totalorder %s36_s24, %s36_s24 }
  0x1b   :  { %p124_p11 = scmp.ne.s32.totalorder %s36_s24, %s123_s4  ;;  %p129_p13 = scmp.lt.s32.totalorder %s123_s4, %s123_s4 }
  0x1d   :  { %p130_p0 = por %p129_p13, %p128_p12 }
  0x1f   :  { %p131_p1 = pnand %p130_p0, %p124_p11 }
  0x21   :  { %134 = shalt.err (!%p131_p1)
}
  0x22   :  { %41 = dma.hbm_to_vmem [thread:$0]  %s220_s1, 256, %s36_s24, [#allocation6], %s164_s19, %s164_s19, %s165_s20  }
  0x23   :  { %157 = dma.done.wait [#allocation3], 256  }
  0x24   :  { %158 = vsyncadd [#allocation3], 4294967040 }
  0x25   :  { %159 = dma.done.wait [#allocation6], 256  }
  0x26   :  { %160 = vsyncadd [#allocation6], 4294967040  ;;  %v57_v0 = vld [vmem:[#allocation2] sm:$0xff]  ;;  %v58_v1 = vld [vmem:[#allocation2 + $0x8] sm:$0xff]  ;;  %s167_s6 = smov [#allocation7]  }
  0x27   :  { %v59_v2 = vld [vmem:[#allocation5] sm:$0xff]  ;;  %v60_v3 = vld [vmem:[#allocation5 + $0x8] sm:$0xff]  ;;  %s75_s7 = sshll.u32 %s167_s6, 4  ;;  %s76_s7 = int_to_ptr.vmem [resolvable:$true] %s75_s7 }
  0x28   :  { %v61_v4 = vsub.f32 %v57_v0, %v59_v2  ;;  %v62_v5 = vsub.f32 %v58_v1, %v60_v3  ;;  %s135_s8 = scalar_lea.vmem %s76_s7, 128  ;;  %p140_p3 = scmp.lt.s32.totalorder %s76_s7, %s76_s7 }
  0x29   :  { %p136_p2 = scmp.ne.s32.totalorder %s76_s7, %s135_s8  ;;  %p141_p4 = scmp.lt.s32.totalorder %s135_s8, %s135_s8 }
  0x2a   :  { %v63_v6 = vmul.f32 %v61_v4, %v61_v4  ;;  %v64_v7 = vmul.f32 %v62_v5, %v62_v5 }
  0x2b   :  { %p142_p5 = por %p141_p4, %p140_p3 }
  0x2c   :  { %v66_v8 = vadd.f32 %v64_v7, %v63_v6 }
  0x2d   :  { %p143_p6 = pnand %p142_p5, %p136_p2 }
  0x2e   :  { %68 = vst [vmem:[#allocation7] sm:$0xff] %v66_v8 }
  0x2f   :  { %146 = shalt.err (!%p143_p6)
}
  0x30   :  { %s147_s10 = scalar_lea.hbm %s221_s2, 128 }
  0x31   :  { %p148_p7 = scmp.ne.s32.totalorder %s221_s2, %s147_s10  ;;  %p151_p8 = scmp.lt.u32.totalorder %s147_s10, %s221_s2 }
  0x33   :  { %p153_p9 = pnand %p151_p8, %p148_p7 }
  0x35   :  { %156 = shalt.err (!%p153_p9)
}
  0x36   :  { %78 = dma.vmem_to_hbm [thread:$0]  %s76_s7, 128, %s221_s2, [#allocation4]  }
  0x37   :  { %161 = dma.done.wait [#allocation4], 128  }
  0x38   :  { %162 = vsyncadd [#allocation4], 4294967168 }
  0x39   :  { %82 = vsyncpa [#allocation3], 1 }
  0x3a   :  { %83 = vsyncpa [#allocation6], 1 }
  0x3b   :  { %84 = vsyncpa [#allocation4], 1 }

</bundles_post_ra>
